<compile_context>
chip_gen: v7x
topology: tpu7x:2x2x1
jax: 0.10.0
libtpu: 0.0.40
codegen_flags: <defaults>
</compile_context>

<pallas_src>
import functools

import jax
import jax.numpy as jnp
from jax.experimental import pallas as pl
from jax.experimental.pallas import tpu as pltpu


# ---------------------------------------------------------------------------
# Fused Pallas kernel: one_model + two_model + concat in a single body
# ---------------------------------------------------------------------------

def combined_kernel(colidx_ref, rowidx_ref, inv_deg_ref,
                    emb_ref, w1p_ref,
                    x_ref, ea_ref, wn_ref, we_ref, bg_ref,
                    w2p_ref, bcat_ref, o_ref, *, bs, src_off):
    # colidx_ref : (src_off + E, 1) int32  rows [0:bs) = token ids,
    #                                      rows [src_off:src_off+E) = edge src
    # rowidx_ref : (3, L) int32            row 0 = seq id per token position,
    #                                      row 1 = edge dst, row 2 = node->graph
    # inv_deg_ref: (B, 1) f32              precomputed 1 / max(|nodes in graph|, 1)
    # emb_ref    : (V, D)   w1p_ref: (D, H)  (w1 * 1/S, zero-padded to H=H1+H2)
    # x_ref      : (N, F)   ea_ref : (E, Fe)
    # wn_ref     : (F, Hg)  we_ref : (Fe, Hg)  bg_ref: (1, Hg)
    # w2p_ref    : (Hg, H)  (w2 placed into columns [H1:H])
    # bcat_ref   : (1, H)   concat(b1, b2)
    # o_ref      : (B, H)   concatenated output
    #
    # NOTE: out-of-range token/src/dst/batch indices produce an all-zero
    # one-hot row (contribution silently dropped) instead of raising like
    # torch index_select / scatter.  Inputs are assumed in-range.
    f32 = jnp.float32
    B, _ = o_ref.shape
    V, _ = emb_ref.shape
    N, _ = x_ref.shape
    E, _ = ea_ref.shape

    # ---- one_model: re-associated chain  (B,bs)@(bs,V) -> (B,V)@(V,D) ----
    tok_col = colidx_ref[0:bs, :]                                        # (bs, 1)
    seq_row = rowidx_ref[0:1, 0:bs]                                      # (1, bs)
    tok_oh = (jax.lax.broadcasted_iota(jnp.int32, (bs, V), 1)
              == tok_col).astype(f32)                                    # (bs, V)
    seq_oh = (jax.lax.broadcasted_iota(jnp.int32, (B, bs), 0)
              == seq_row).astype(f32)                                    # (B, bs)
    tok_counts = jnp.dot(seq_oh, tok_oh, preferred_element_type=f32)     # (B, V)
    pooled_sum = jnp.dot(tok_counts, emb_ref[...],
                         preferred_element_type=f32)                     # (B, D)
    # (the 1/S of the mean is folded into w1p in the wrapper)

    # ---- two_model: message passing + scatter-relu + mean pool ----
    src_col = colidx_ref[src_off:src_off + E, :]                         # (E, 1)
    dst_row = rowidx_ref[1:2, 0:E]                                       # (1, E)
    bat_row = rowidx_ref[2:3, 0:N]                                       # (1, N)

    gath = (jax.lax.broadcasted_iota(jnp.int32, (E, N), 1)
            == src_col).astype(f32)                                      # (E, N)
    x_src = jnp.dot(gath, x_ref[...], preferred_element_type=f32)        # (E, F)
    msg = (jnp.dot(x_src, wn_ref[...], preferred_element_type=f32)
           + jnp.dot(ea_ref[...], we_ref[...], preferred_element_type=f32)
           + bg_ref[...])                                                # (E, Hg)
    scat = (jax.lax.broadcasted_iota(jnp.int32, (N, E), 0)
            == dst_row).astype(f32)                                      # (N, E)
    node_h = jnp.maximum(
        jnp.dot(scat, msg, preferred_element_type=f32), 0.0)             # (N, Hg)
    pool = (jax.lax.broadcasted_iota(jnp.int32, (B, N), 0)
            == bat_row).astype(f32) * inv_deg_ref[...]                   # (B, N)
    graph_h = jnp.dot(pool, node_h, preferred_element_type=f32)          # (B, Hg)

    # ---- concat fused into the output projections: one full-width store ----
    o_ref[...] = (jnp.dot(pooled_sum, w1p_ref[...], preferred_element_type=f32)
                  + jnp.dot(graph_h, w2p_ref[...], preferred_element_type=f32)
                  + bcat_ref[...])                                       # (B, H1+H2)


# ---------------------------------------------------------------------------
# Wrapper: single pallas_call, full arrays in VMEM, no grid
# ---------------------------------------------------------------------------

def combined_model_forward(params,
                           token_idx_batch,   # (B, S) int32
                           x_batch,           # (N, F) float32
                           edge_index_batch,  # (2, E) int32
                           edge_attr_batch,   # (E, Fe) float32
                           batch_batch):      # (N,)  int32 graph assignment
    B, S = token_idx_batch.shape
    BS = B * S
    D, H1 = params["w1"].shape
    Hg, H2 = params["w2"].shape
    H = H1 + H2
    N = x_batch.shape[0]
    E = edge_attr_batch.shape[0]

    # Fold torch.cat (and the 1/S of the sequence mean) into the final
    # projections once, outside the kernel, so the kernel finishes with a
    # single lane-dense (B, H1+H2) store.
    w1p = jnp.pad(params["w1"] * (1.0 / S), ((0, 0), (0, H2)))           # (D, H)
    w2p = jnp.pad(params["w2"], ((0, 0), (H1, 0)))                       # (Hg, H)
    bcat = jnp.concatenate([params["b1"], params["b2"]], axis=1)         # (1, H)

    # Pack the five int32 index vectors into two small arrays (fewer DMA
    # descriptors / inputs for this overhead-bound kernel).
    cpad = ((BS + 7) // 8) * 8                     # keep src slice 8-sublane aligned
    colidx = jnp.zeros((cpad + E, 1), jnp.int32)
    colidx = colidx.at[:BS, 0].set(token_idx_batch.reshape(-1).astype(jnp.int32))
    colidx = colidx.at[cpad:cpad + E, 0].set(edge_index_batch[0].astype(jnp.int32))

    L = max(BS, E, N)
    rowidx = jnp.zeros((3, L), jnp.int32)
    rowidx = rowidx.at[0, :BS].set(jnp.arange(BS, dtype=jnp.int32) // S)   # seq ids
    rowidx = rowidx.at[1, :E].set(edge_index_batch[1].astype(jnp.int32))   # dst
    rowidx = rowidx.at[2, :N].set(batch_batch.astype(jnp.int32))           # node->graph

    # Per-graph inverse node counts precomputed host/XLA-side (keeps the
    # cross-lane count + divide out of the kernel body).
    deg = jax.ops.segment_sum(jnp.ones((N,), jnp.float32),
                              batch_batch.astype(jnp.int32), num_segments=B)
    inv_deg = (1.0 / jnp.maximum(deg, 1.0)).reshape(B, 1).astype(jnp.float32)

    args = (colidx, rowidx, inv_deg,
            params["emb_table"], w1p,
            x_batch, edge_attr_batch, params["wn"], params["we"], params["bg"],
            w2p, bcat)

    vmem = lambda: pl.BlockSpec(memory_space=pltpu.MemorySpace.VMEM)
    kernel = functools.partial(combined_kernel, bs=BS, src_off=cpad)
    return pl.pallas_call(
        kernel,
        out_shape=jax.ShapeDtypeStruct((B, H), jnp.float32),
        in_specs=[vmem() for _ in args],
        out_specs=vmem(),
    )(*args)


# ---------------------------------------------------------------------------
# Deterministic parameter construction
# ---------------------------------------------------------------------------

def make_params(key, V, D, H1, F, Fe, Hg, H2):
    ks = jax.random.split(key, 8)
    return {
        "emb_table": 0.1 * jax.random.normal(ks[0], (V, D), jnp.float32),
        "w1": 0.1 * jax.random.normal(ks[1], (D, H1), jnp.float32),
        "b1": 0.01 * jax.random.normal(ks[2], (1, H1), jnp.float32),
        "wn": 0.1 * jax.random.normal(ks[3], (F, Hg), jnp.float32),
        "we": 0.1 * jax.random.normal(ks[4], (Fe, Hg), jnp.float32),
        "bg": 0.01 * jax.random.normal(ks[5], (1, Hg), jnp.float32),
        "w2": 0.1 * jax.random.normal(ks[6], (Hg, H2), jnp.float32),
        "b2": 0.01 * jax.random.normal(ks[7], (1, H2), jnp.float32),
    }


if __name__ == "__main__":
    # Small, deterministic shapes.
    B, S = 2, 8          # batch of token sequences
    V, D, H1 = 32, 16, 12
    N, F, Fe = 10, 6, 4  # graph: nodes, node-feat dim, edge-feat dim
    E, Hg, H2 = 20, 16, 8

    key = jax.random.PRNGKey(0)
    k_tok, k_x, k_src, k_dst, k_ea, k_par = jax.random.split(key, 6)

    token_idx_batch = jax.random.randint(k_tok, (B, S), 0, V, dtype=jnp.int32)
    x_batch = jax.random.normal(k_x, (N, F), jnp.float32)
    src = jax.random.randint(k_src, (E,), 0, N, dtype=jnp.int32)
    dst = jax.random.randint(k_dst, (E,), 0, N, dtype=jnp.int32)
    edge_index_batch = jnp.stack([src, dst], axis=0)               # (2, E)
    edge_attr_batch = jax.random.normal(k_ea, (E, Fe), jnp.float32)
    batch_batch = jnp.concatenate(
        [jnp.zeros((N // 2,), jnp.int32), jnp.ones((N - N // 2,), jnp.int32)]
    )                                                              # node -> graph id

    params = make_params(k_par, V, D, H1, F, Fe, Hg, H2)

    out = combined_model_forward(params, token_idx_batch, x_batch,
                                 edge_index_batch, edge_attr_batch, batch_batch)
    out = jax.block_until_ready(out)
    assert out.shape == (B, H1 + H2), out.shape

    # Pure-JAX reference (general per-graph counts, not hard-coded N//2).
    emb = jnp.take(params["emb_table"], token_idx_batch, axis=0)
    ref1 = emb.mean(axis=1) @ params["w1"] + params["b1"]
    msg = (x_batch[src] @ params["wn"] + edge_attr_batch @ params["we"]
           + params["bg"])
    node_h = jnp.maximum(jax.ops.segment_sum(msg, dst, num_segments=N), 0.0)
    deg = jax.ops.segment_sum(jnp.ones((N,), jnp.float32), batch_batch,
                              num_segments=B)
    graph_h = (jax.ops.segment_sum(node_h, batch_batch, num_segments=B)
               / jnp.maximum(deg, 1.0)[:, None])
    ref2 = graph_h @ params["w2"] + params["b2"]
    ref = jnp.concatenate([ref1, ref2], axis=1)
    assert jnp.allclose(out, ref, atol=1e-4, rtol=1e-4), (out, ref)

    print("KERNEL_OK")
</pallas_src>

<mosaic_0001>
module attributes {stable_mosaic.version = 11 : i64} {
  func.func @combined_kernel(%arg0: memref<36x1xi32, #tpu.memory_space<vmem>>, %arg1: memref<3x20xi32, #tpu.memory_space<vmem>>, %arg2: memref<2x1xf32, #tpu.memory_space<vmem>>, %arg3: memref<32x16xf32, #tpu.memory_space<vmem>>, %arg4: memref<16x20xf32, #tpu.memory_space<vmem>>, %arg5: memref<10x6xf32, #tpu.memory_space<vmem>>, %arg6: memref<20x4xf32, #tpu.memory_space<vmem>>, %arg7: memref<6x16xf32, #tpu.memory_space<vmem>>, %arg8: memref<4x16xf32, #tpu.memory_space<vmem>>, %arg9: memref<1x16xf32, #tpu.memory_space<vmem>>, %arg10: memref<16x20xf32, #tpu.memory_space<vmem>>, %arg11: memref<1x20xf32, #tpu.memory_space<vmem>>, %arg12: memref<2x20xf32, #tpu.memory_space<vmem>>) attributes {dimension_semantics = [], scalar_prefetch = 0 : i64, scratch_operands = 0 : i64, tpu.core_type = #tpu.core_type<tc>} {
    %c0 = arith.constant 0 : index
    %c0_0 = arith.constant 0 : index
    %0 = vector.load %arg0[%c0, %c0_0] : memref<36x1xi32, #tpu.memory_space<vmem>>, vector<16x1xi32>
    %c0_1 = arith.constant 0 : index
    %c0_2 = arith.constant 0 : index
    %1 = vector.load %arg1[%c0_1, %c0_2] : memref<3x20xi32, #tpu.memory_space<vmem>>, vector<1x16xi32>
    %2 = tpu.iota {dimensions = array<i32: 1>} : vector<16x32xi32>
    %3 = vector.broadcast %0 : vector<16x1xi32> to vector<16x32xi32>
    %4 = arith.cmpi eq, %2, %3 : vector<16x32xi32>
    %5 = arith.extui %4 : vector<16x32xi1> to vector<16x32xi32>
    %6 = arith.sitofp %5 : vector<16x32xi32> to vector<16x32xf32>
    %7 = tpu.iota {dimensions = array<i32: 0>} : vector<2x16xi32>
    %8 = vector.broadcast %1 : vector<1x16xi32> to vector<2x16xi32>
    %9 = arith.cmpi eq, %7, %8 : vector<2x16xi32>
    %10 = arith.extui %9 : vector<2x16xi1> to vector<2x16xi32>
    %11 = arith.sitofp %10 : vector<2x16xi32> to vector<2x16xf32>
    %cst = arith.constant dense<0.000000e+00> : vector<2x32xf32>
    %12 = tpu.matmul %11, %6, %cst {dimension_numbers = #tpu.dot_dimension_numbers<[1], [0], [0], [1], [0, 0, 1, 1], [], []>} : vector<2x16xf32>, vector<16x32xf32>, vector<2x32xf32> -> vector<2x32xf32>
    %c0_3 = arith.constant 0 : index
    %c0_4 = arith.constant 0 : index
    %13 = vector.load %arg3[%c0_3, %c0_4] : memref<32x16xf32, #tpu.memory_space<vmem>>, vector<32x16xf32>
    %cst_5 = arith.constant dense<0.000000e+00> : vector<2x16xf32>
    %14 = tpu.matmul %12, %13, %cst_5 {dimension_numbers = #tpu.dot_dimension_numbers<[1], [0], [0], [1], [0, 0, 1, 1], [], []>} : vector<2x32xf32>, vector<32x16xf32>, vector<2x16xf32> -> vector<2x16xf32>
    %c16 = arith.constant 16 : index
    %c0_6 = arith.constant 0 : index
    %15 = vector.load %arg0[%c16, %c0_6] : memref<36x1xi32, #tpu.memory_space<vmem>>, vector<20x1xi32>
    %c1 = arith.constant 1 : index
    %c0_7 = arith.constant 0 : index
    %16 = vector.load %arg1[%c1, %c0_7] : memref<3x20xi32, #tpu.memory_space<vmem>>, vector<1x20xi32>
    %c2 = arith.constant 2 : index
    %c0_8 = arith.constant 0 : index
    %17 = vector.load %arg1[%c2, %c0_8] : memref<3x20xi32, #tpu.memory_space<vmem>>, vector<1x10xi32>
    %18 = tpu.iota {dimensions = array<i32: 1>} : vector<20x10xi32>
    %19 = vector.broadcast %15 : vector<20x1xi32> to vector<20x10xi32>
    %20 = arith.cmpi eq, %18, %19 : vector<20x10xi32>
    %21 = arith.extui %20 : vector<20x10xi1> to vector<20x10xi32>
    %22 = arith.sitofp %21 : vector<20x10xi32> to vector<20x10xf32>
    %c0_9 = arith.constant 0 : index
    %c0_10 = arith.constant 0 : index
    %23 = vector.load %arg5[%c0_9, %c0_10] : memref<10x6xf32, #tpu.memory_space<vmem>>, vector<10x6xf32>
    %cst_11 = arith.constant dense<0.000000e+00> : vector<20x6xf32>
    %24 = tpu.matmul %22, %23, %cst_11 {dimension_numbers = #tpu.dot_dimension_numbers<[1], [0], [0], [1], [0, 0, 1, 1], [], []>} : vector<20x10xf32>, vector<10x6xf32>, vector<20x6xf32> -> vector<20x6xf32>
    %c0_12 = arith.constant 0 : index
    %c0_13 = arith.constant 0 : index
    %25 = vector.load %arg7[%c0_12, %c0_13] : memref<6x16xf32, #tpu.memory_space<vmem>>, vector<6x16xf32>
    %cst_14 = arith.constant dense<0.000000e+00> : vector<20x16xf32>
    %26 = tpu.matmul %24, %25, %cst_14 {dimension_numbers = #tpu.dot_dimension_numbers<[1], [0], [0], [1], [0, 0, 1, 1], [], []>} : vector<20x6xf32>, vector<6x16xf32>, vector<20x16xf32> -> vector<20x16xf32>
    %c0_15 = arith.constant 0 : index
    %c0_16 = arith.constant 0 : index
    %27 = vector.load %arg6[%c0_15, %c0_16] : memref<20x4xf32, #tpu.memory_space<vmem>>, vector<20x4xf32>
    %c0_17 = arith.constant 0 : index
    %c0_18 = arith.constant 0 : index
    %28 = vector.load %arg8[%c0_17, %c0_18] : memref<4x16xf32, #tpu.memory_space<vmem>>, vector<4x16xf32>
    %cst_19 = arith.constant dense<0.000000e+00> : vector<20x16xf32>
    %29 = tpu.matmul %27, %28, %cst_19 {dimension_numbers = #tpu.dot_dimension_numbers<[1], [0], [0], [1], [0, 0, 1, 1], [], []>} : vector<20x4xf32>, vector<4x16xf32>, vector<20x16xf32> -> vector<20x16xf32>
    %30 = arith.addf %26, %29 : vector<20x16xf32>
    %c0_20 = arith.constant 0 : index
    %c0_21 = arith.constant 0 : index
    %31 = vector.load %arg9[%c0_20, %c0_21] : memref<1x16xf32, #tpu.memory_space<vmem>>, vector<1x16xf32>
    %32 = vector.broadcast %31 : vector<1x16xf32> to vector<20x16xf32>
    %33 = arith.addf %30, %32 : vector<20x16xf32>
    %34 = tpu.iota {dimensions = array<i32: 0>} : vector<10x20xi32>
    %35 = vector.broadcast %16 : vector<1x20xi32> to vector<10x20xi32>
    %36 = arith.cmpi eq, %34, %35 : vector<10x20xi32>
    %37 = arith.extui %36 : vector<10x20xi1> to vector<10x20xi32>
    %38 = arith.sitofp %37 : vector<10x20xi32> to vector<10x20xf32>
    %cst_22 = arith.constant dense<0.000000e+00> : vector<10x16xf32>
    %39 = tpu.matmul %38, %33, %cst_22 {dimension_numbers = #tpu.dot_dimension_numbers<[1], [0], [0], [1], [0, 0, 1, 1], [], []>} : vector<10x20xf32>, vector<20x16xf32>, vector<10x16xf32> -> vector<10x16xf32>
    %cst_23 = arith.constant 0.000000e+00 : f32
    %40 = vector.broadcast %cst_23 : f32 to vector<10x16xf32>
    %41 = arith.maximumf %39, %40 : vector<10x16xf32>
    %42 = tpu.iota {dimensions = array<i32: 0>} : vector<2x10xi32>
    %43 = vector.broadcast %17 : vector<1x10xi32> to vector<2x10xi32>
    %44 = arith.cmpi eq, %42, %43 : vector<2x10xi32>
    %45 = arith.extui %44 : vector<2x10xi1> to vector<2x10xi32>
    %46 = arith.sitofp %45 : vector<2x10xi32> to vector<2x10xf32>
    %c0_24 = arith.constant 0 : index
    %c0_25 = arith.constant 0 : index
    %47 = vector.load %arg2[%c0_24, %c0_25] : memref<2x1xf32, #tpu.memory_space<vmem>>, vector<2x1xf32>
    %48 = vector.broadcast %47 : vector<2x1xf32> to vector<2x10xf32>
    %49 = arith.mulf %46, %48 : vector<2x10xf32>
    %cst_26 = arith.constant dense<0.000000e+00> : vector<2x16xf32>
    %50 = tpu.matmul %49, %41, %cst_26 {dimension_numbers = #tpu.dot_dimension_numbers<[1], [0], [0], [1], [0, 0, 1, 1], [], []>} : vector<2x10xf32>, vector<10x16xf32>, vector<2x16xf32> -> vector<2x16xf32>
    %c0_27 = arith.constant 0 : index
    %c0_28 = arith.constant 0 : index
    %51 = vector.load %arg4[%c0_27, %c0_28] : memref<16x20xf32, #tpu.memory_space<vmem>>, vector<16x20xf32>
    %cst_29 = arith.constant dense<0.000000e+00> : vector<2x20xf32>
    %52 = tpu.matmul %14, %51, %cst_29 {dimension_numbers = #tpu.dot_dimension_numbers<[1], [0], [0], [1], [0, 0, 1, 1], [], []>} : vector<2x16xf32>, vector<16x20xf32>, vector<2x20xf32> -> vector<2x20xf32>
    %c0_30 = arith.constant 0 : index
    %c0_31 = arith.constant 0 : index
    %53 = vector.load %arg10[%c0_30, %c0_31] : memref<16x20xf32, #tpu.memory_space<vmem>>, vector<16x20xf32>
    %cst_32 = arith.constant dense<0.000000e+00> : vector<2x20xf32>
    %54 = tpu.matmul %50, %53, %cst_32 {dimension_numbers = #tpu.dot_dimension_numbers<[1], [0], [0], [1], [0, 0, 1, 1], [], []>} : vector<2x16xf32>, vector<16x20xf32>, vector<2x20xf32> -> vector<2x20xf32>
    %55 = arith.addf %52, %54 : vector<2x20xf32>
    %c0_33 = arith.constant 0 : index
    %c0_34 = arith.constant 0 : index
    %56 = vector.load %arg11[%c0_33, %c0_34] : memref<1x20xf32, #tpu.memory_space<vmem>>, vector<1x20xf32>
    %57 = vector.broadcast %56 : vector<1x20xf32> to vector<2x20xf32>
    %58 = arith.addf %55, %57 : vector<2x20xf32>
    %c0_35 = arith.constant 0 : index
    %c0_36 = arith.constant 0 : index
    %59 = vector.load %arg12[%c0_35, %c0_36] : memref<2x20xf32, #tpu.memory_space<vmem>>, vector<2x20xf32>
    tpu.vector_store %arg12[%c0_35, %c0_36], %58 {strides = array<i32>} : memref<2x20xf32, #tpu.memory_space<vmem>>, vector<2x20xf32>,
    return
  }
}

</mosaic_0001>

<bundles_post_ra>
// kernel: tpu_custom_call.1
= control target key start
LH: loop header
LB: loop body
LE: loop exit
PB: predicated region body
PF: predicated region fallthrough
CT: control target
= control target key end

     0   :  { %v1119_v2 = vmov 0   ;;  %s1357_s0 = inlined_call_operand.vmem [shape: s32[36,1], index: 0, kind: input, shape index: {}]   ;;  %s1358_s1 = inlined_call_operand.vmem [shape: s32[3,20], index: 1, kind: input, shape index: {}]   ;;  %s1359_s2 = inlined_call_operand.vmem [shape: f32[2,1], index: 2, kind: input, shape index: {}]   ;;  %s1360_s3 = inlined_call_operand.vmem [shape: f32[32,16], index: 3, kind: input, shape index: {}]   ;;  %s1361_s4 = inlined_call_operand.vmem [shape: f32[16,20], index: 4, kind: input, shape index: {}]   ;;  %s1362_s5 = inlined_call_operand.vmem [shape: f32[10,6], index: 5, kind: input, shape index: {}]   ;;  %s1363_s6 = inlined_call_operand.vmem [shape: f32[20,4], index: 6, kind: input, shape index: {}]   ;;  %s1364_s7 = inlined_call_operand.vmem [shape: f32[6,16], index: 7, kind: input, shape index: {}]   ;;  %s1365_s8 = inlined_call_operand.vmem [shape: f32[4,16], index: 8, kind: input, shape index: {}]   ;;  %s1366_s9 = inlined_call_operand.vmem [shape: f32[1,16], index: 9, kind: input, shape index: {}]   ;;  %s1367_s10 = inlined_call_operand.vmem [shape: f32[16,20], index: 10, kind: input, shape index: {}]   ;;  %s1368_s11 = inlined_call_operand.vmem [shape: f32[1,20], index: 11, kind: input, shape index: {}]   ;;  %s1369_s12 = inlined_call_operand.hbm [shape: f32[2,20], index: 12, kind: output, shape index: {}]  }
   0x1   :  { %v42_v0 = vld [vmem:[%s1357_s0] sm:$0xff]  ;;  %v220_v1 = vld [vmem:[%s1357_s0 + $0x10] sm:$0xff]  ;;  %1093 = vset.pattern.permute.xlu0 %v1119_v2  ;;  %1094 = vset.pattern.permute.xlu1 %v1119_v2 }
   0x2   :  { %48 = vperm.xlu0 %1093, %v42_v0   ;;  %226 = vperm.xlu1 %1094, %v220_v1  }
   0x3   :  { %17 = vsyncpa [#allocation3], 0  ;;  %v43_v3 = vld [vmem:[%s1357_s0 + $0x8] sm:$0xff]  ;;  %v221_v4 = vld [vmem:[%s1357_s0 + $0x18] sm:$0xff]  ;;  %v1120_v7 = vmov 0.0|0.0   ;;  %vm1121_vm0 = vmmov 0   ;;  %v45_v15 = vlaneseq }
   0x4   :  { %v222_v5 = vld [vmem:[%s1357_s0 + $0x20] sm:$0xf]  ;;  %1059 = vmatprep.subr.bf16.mxu0 %v1120_v7  ;;  %1062 = vmatprep.subr.bf16.mxu1 %v1120_v7  ;;  %v1122_v8 = vmov 0.0   ;;  %v143_v10 = vld [vmem:[%s1360_s3 + $0x8] sm:$0xff]  ;;  %v144_v11 = vld [vmem:[%s1360_s3 + $0x10] sm:$0xff]  ;;  %vm255_vm4 = vcmask 1041408  }
   0x5   :  { %v647_v6 = vld [vmem:[%s1359_s2] sm:$0x3]  ;;  %980 = vmatprep.mubr.msk.f32.mxu0 %vm1121_vm0, %v1122_v8  ;;  %991 = vmatprep.mubr.msk.f32.mxu1 %vm1121_vm0, %v1122_v8  ;;  %v145_v13 = vld [vmem:[%s1360_s3 + $0x18] sm:$0xff]  ;;  %v1229_v17 = vshrl.u32 %v45_v15, 7  ;;  %v46_v18 = vand.u32 127, %v45_v15  ;;  %vm68_vm6 = vcmask 130048  }
   0x6   :  { %51 = vperm.xlu0 %1093, %v43_v3   ;;  %229 = vperm.xlu1 %1094, %v221_v4   ;;  %v142_v9 = vld [vmem:[%s1360_s3] sm:$0xff]  ;;  %v1066_v14 = vpack.c.bf16 %v145_v13, %v144_v11  ;;  %v244_v22 = vld [vmem:[%s1362_s5 + $0x8] sm:$0x3]  ;;  %v1123_v24 = vmov 1.0|1.0   ;;  %vm1124_vm8 = vmmov 1  }
   0x7   :  { %v1063_v12 = vpack.c.bf16 %v143_v10, %v142_v9  ;;  %v906_v19 = vld [vmem:[%s1358_s1] ss:$0 sm:$0xff]  ;;  %vm1243_vm9 = vmpackc.low %vm255_vm4, %vm1124_vm8  ;;  %vm245_vm10 = vcmask 80896   ;;  %vm448_vm13 = vcmask 1045504   ;;  %vm146_vm14 = vcmask 261120   ;;  %v341_v40 = vld [vmem:[%s1363_s6 + $0x8] sm:$0xff] }
   0x8   :  { %vm65_vm1 = vcmp.eq.s32.totalorder %v1229_v17, %v906_v19  ;;  %v243_v21 = vld [vmem:[%s1362_s5] sm:$0xff]  ;;  %vm354_vm15 = vcmask 1043456   ;;  %v342_v43 = vld [vmem:[%s1363_s6 + $0x10] sm:$0xf]  ;;  %vm553_vm4 = vcmask 162816   ;;  %v542_v63 = vadd.s32 8, %v1229_v17 }
   0x9   :  { %1064 = vmatpush3.bf16.msra.mxu1 %v1063_v12  ;;  %v907_v25 = vsel %vm65_vm1, 1.0, %v1122_v8  ;;  %v1069_v26 = vpack.c.bf16 %v244_v22, %v243_v21  ;;  %v339_v33 = vld [vmem:[%s1364_s7] sm:$0x3f]  ;;  %vm344_vm1 = vcmask 31744   ;;  %v733_v11 = vld [vmem:[%s1367_s10 + $0x8] sm:$0xff]  ;;  %vm888_vm8 = vcmask 156672  }
   0xa   :  { %232 = vperm.xlu0 %1093, %v222_v5   ;;  %650 = vperm.xlu1 %1094, %v647_v6   ;;  %v343_v34 = vld [vmem:[%s1365_s8] sm:$0xf] }
   0xb   :  { %1065 = vmatprep.subr.bf16.mxu1 %v1120_v7  ;;  %v340_v37 = vld [vmem:[%s1363_s6] sm:$0xff] }
   0xc   :  { %v928_v46 = vld [vmem:[%s1358_s1 + $0x1] ss:$0 sm:$0xff]  ;;  %v927_v55 = vld [vmem:[%s1366_s9] ss:$0 sm:$0xff]  ;;  %v934_v13 = vld [vmem:[%s1358_s1 + $0x2] ss:$0 sm:$0xff] }
   0xd   :  { %1067 = vmatpush3.bf16.msra.mxu1 %v1066_v14  ;;  %v732_v10 = vld [vmem:[%s1367_s10] sm:$0xff]  ;;  %s1125_s10 = smov [#allocation2]  }
   0xe   :  { %1007 = vmatprep.subr.mxu1 %v1122_v8  ;;  %v1081_v12 = vpack.c.bf16 %v733_v11, %v732_v10  ;;  %v730_v19 = vld [vmem:[%s1361_s4] sm:$0xff]  ;;  %s896_s24 = sshll.u32 %s1125_s10, 4  ;;  %s897_s24 = int_to_ptr.vmem [resolvable:$true] %s896_s24 }
   0xf   :  { %s1095_s25 = scalar_lea.vmem %s897_s24, 32  ;;  %p1100_p1 = scmp.lt.s32.totalorder %s897_s24, %s897_s24 }
  0x10   :  { %p1096_p0 = scmp.ne.s32.totalorder %s897_s24, %s1095_s25  ;;  %p1101_p2 = scmp.lt.s32.totalorder %s1095_s25, %s1095_s25 }
  0x12   :  { %p1102_p3 = por %p1101_p2, %p1100_p1 }
  0x14   :  { %p1103_p4 = pnand %p1102_p3, %p1096_p0 }
  0x81   :  { %v49_v16 = vpop.permute.xlu0 %48  ;;  %v227_v23 = vpop.permute.xlu1 %226 }
  0x82   :  { %vm53_vm2 = vcmp.eq.s32.totalorder %v46_v18, %v49_v16  ;;  %vm234_vm7 = vcmp.eq.s32.totalorder %v46_v18, %v227_v23 }
  0x83   :  { %v912_v28 = vsel %vm234_vm7, 1.0, %v1122_v8  ;;  %vm644_vm7 = vcmp.eq.s32.totalorder %v1229_v17, %v934_v13 }
  0x84   :  { %v935_v22 = vsel %vm644_vm7, 1.0, %v1122_v8 }
  0x85   :  { %v52_v20 = vpop.permute.xlu0 %51  ;;  %v230_v29 = vpop.permute.xlu1 %229 }
  0x86   :  { %vm54_vm3 = vcmp.eq.s32.totalorder %v46_v18, %v52_v20  ;;  %vm235_vm11 = vcmp.eq.s32.totalorder %v46_v18, %v230_v29  ;;  %v731_v20 = vld [vmem:[%s1361_s4 + $0x8] sm:$0xff] }
  0x87   :  { %vm1060_vm5 = vmpackc.low %vm54_vm3, %vm53_vm2  ;;  %v913_v31 = vsel %vm235_vm11, 1.0, %v1122_v8  ;;  %vm438_vm2 = vcmask 48128   ;;  %vm547_vm3 = vcmp.eq.s32.totalorder %v1229_v17, %v928_v46 }
  0x88   :  { %1061 = vmatpush3.bf16.msk.msra.mxu0 %vm1060_vm5, %v1123_v24  ;;  %v929_v47 = vsel %vm547_vm3, 1.0, %v1122_v8  ;;  %vm548_vm5 = vcmp.eq.s32.totalorder %v542_v63, %v928_v46  ;;  %v1084_v24 = vpack.c.bf16 %v731_v20, %v730_v19 }
  0x89   :  { %1068 = vmatprep.subr.bf16.mxu0 %v1120_v7  ;;  %v233_v30 = vpop.permute.xlu0 %232  ;;  %v930_v9 = vsel %vm548_vm5, 1.0, %v1122_v8  ;;  %v651_v21 = vpop.permute.xlu1 %650 }
  0x8a   :  { %vm236_vm12 = vcmp.eq.s32.totalorder %v46_v18, %v233_v30  ;;  %v653_v17 = vmul.f32 %v935_v22, %v651_v21  ;;  %v940_v30 = vld [vmem:[%s1368_s11] ss:$0 sm:$0xff] }
  0x8b   :  { %981 = vmatmul.mubr.msk.f32.vlgmr.msra.gmra.mrb[0].mxu0 %vm68_vm6, %v907_v25  ;;  %v914_v32 = vsel %vm236_vm12, 1.0, %v1122_v8 }
  0x8c   :  { %1071 = vmatpush3.bf16.msk.msra.mxu0 %vm1243_vm9, %v1069_v26  ;;  %998 = vmatprep.mubr.msk.f32.mxu0 %vm1121_vm0, %v1122_v8 }
  0x8d   :  { %1018 = vmatprep.subr.mxu0 %v1122_v8 }
  0x8f   :  { %999 = vmatmul.mubr.msk.f32.vlgmr.msra.gmra.mrb[2].mxu0 %vm245_vm10, %v912_v28 }
  0x90   :  { %1001 = vmatprep.mubr.msk.f32.mxu0 %vm1121_vm0, %v1122_v8  ;;  %1019 = vmatpush3.msk.msra.mxu0 %vm448_vm13, %v339_v33 }
  0x91   :  { %1080 = vmatprep.subr.bf16.mxu0 %v1120_v7 }
  0x93   :  { %1002 = vmatmul.mubr.msk.f32.gmra.mrb[4].mxu0 %vm245_vm10, %v913_v31 }
  0x94   :  { %1004 = vmatprep.mubr.msk.f32.mxu0 %vm1121_vm0, %v1122_v8 }
  0x97   :  { %1005 = vmatmul.mubr.msk.f32.gmra.mrb[6].mxu0 %vm245_vm10, %v914_v32 }
  0x98   :  { %1020 = vmatprep.mubr.msk.f32.mxu0 %vm1121_vm0, %v1122_v8 }
 0x15e   :  { %v138_v35 = vpop.f32.mrb[0].mxu0 }
 0x15f   :  { %v982_v36 = vpop.f32.mrb[1].mxu0  ;;  %992 = vmatmul.mubr.msk.f32.vlgmr.msra.gmra.mrb[0].mxu1 %vm146_vm14, %v138_v35 }
 0x160   :  { %1008 = vmatpush3.msk.msra.mxu1 %vm354_vm15, %v343_v34  ;;  %1009 = vmatprep.mubr.msk.f32.mxu1 %vm1121_vm0, %v1122_v8 }
 0x162   :  { %v325_v38 = vpop.f32.mrb[2].mxu0 }
 0x163   :  { %v1000_v39 = vpop.f32.mrb[3].mxu0  ;;  %1010 = vmatmul.mubr.msk.f32.vlgmr.msra.gmra.mrb[2].mxu1 %vm344_vm1, %v340_v37  ;;  %1021 = vmatmul.mubr.msk.f32.vlgmr.msra.gmra.mrb[8].mxu0 %vm438_vm2, %v325_v38 }
 0x164   :  { %1012 = vmatprep.mubr.msk.f32.mxu1 %vm1121_vm0, %v1122_v8  ;;  %1023 = vmatprep.mubr.msk.f32.mxu0 %vm1121_vm0, %v1122_v8 }
 0x165   :  { %1082 = vmatpush3.bf16.msra.mxu0 %v1081_v12 }
 0x166   :  { %v330_v41 = vpop.f32.mrb[4].mxu0 }
 0x167   :  { %v1003_v42 = vpop.f32.mrb[5].mxu0  ;;  %1013 = vmatmul.mubr.msk.f32.gmra.mrb[4].mxu1 %vm344_vm1, %v341_v40  ;;  %1024 = vmatmul.mubr.msk.f32.gmra.mrb[10].mxu0 %vm438_vm2, %v330_v41 }
 0x168   :  { %1015 = vmatprep.mubr.msk.f32.mxu1 %vm1121_vm0, %v1122_v8  ;;  %1026 = vmatprep.mubr.msk.f32.mxu0 %vm1121_vm0, %v1122_v8 }
 0x16a   :  { %v335_v44 = vpop.f32.mrb[6].mxu0 }
 0x16b   :  { %v1006_v45 = vpop.f32.mrb[7].mxu0  ;;  %1016 = vmatmul.mubr.msk.f32.gmra.mrb[6].mxu1 %vm344_vm1, %v342_v43  ;;  %1027 = vmatmul.mubr.msk.f32.gmra.mrb[12].mxu0 %vm438_vm2, %v335_v44 }
 0x16c   :  { %1049 = vmatprep.mubr.msk.f32.mxu0 %vm1121_vm0, %v1122_v8  ;;  %1035 = vmatprep.mubr.msk.f32.mxu1 %vm553_vm4, %v929_v47 }
 0x232   :  { %v216_v48 = vpop.f32.mrb[0].mxu1 }
 0x233   :  { %v993_v49 = vpop.f32.mrb[1].mxu1 }
 0x236   :  { %v424_v50 = vpop.f32.mrb[2].mxu1  ;;  %v518_v51 = vpop.f32.mrb[8].mxu0 }
 0x237   :  { %v519_v52 = vadd.f32 %v518_v51, %v424_v50  ;;  %v1011_v53 = vpop.f32.mrb[3].mxu1  ;;  %v1022_v54 = vpop.f32.mrb[9].mxu0 }
 0x239   :  { %v539_v61 = vadd.f32 %v927_v55, %v519_v52 }
 0x23a   :  { %v429_v56 = vpop.f32.mrb[4].mxu1  ;;  %v523_v57 = vpop.f32.mrb[10].mxu0 }
 0x23b   :  { %v524_v58 = vadd.f32 %v523_v57, %v429_v56  ;;  %v1014_v59 = vpop.f32.mrb[5].mxu1  ;;  %v1025_v60 = vpop.f32.mrb[11].mxu0 }
 0x23d   :  { %v540_v62 = vadd.f32 %v927_v55, %v524_v58 }
 0x23e   :  { %v434_v0 = vpop.f32.mrb[6].mxu1  ;;  %v528_v1 = vpop.f32.mrb[12].mxu0 }
 0x23f   :  { %v529_v2 = vadd.f32 %v528_v1, %v434_v0  ;;  %v1028_v3 = vpop.f32.mrb[13].mxu0  ;;  %v1072_v4 = vpack.c.bf16 %v540_v62, %v539_v61  ;;  %v1017_v5 = vpop.f32.mrb[7].mxu1 }
 0x241   :  { %v541_v6 = vadd.f32 %v927_v55, %v529_v2  ;;  %1073 = vmatprep.subr.bf16.mxu1 %v1072_v4 }
 0x242   :  { %1075 = vmatpush3.bf16.msra.mxu1 %v1072_v4 }
 0x243   :  { %1033 = vmatprep.subr.msk.mxu1 %vm354_vm15, %v541_v6 }
 0x246   :  { %1034 = vmatpush3.msk.msra.mxu1 %vm354_vm15, %v541_v6 }
 0x247   :  { %1036 = vmatmul.mubr.msk.f32.vlgmr.msra.gmra.mrb[8].mxu1 %vm553_vm4, %v930_v9  ;;  %1076 = vmatprep.subr.bf16.mxu1 %v1120_v7 }
 0x248   :  { %1042 = vmatprep.mubr.msk.f32.mxu1 %vm1121_vm0, %v1122_v8 }
 0x31a   :  { %v1037_v14 = vpop.f32.mrb[8].mxu1 }
 0x31b   :  { %v639_v15 = vmax.f32 %v1037_v14, 0.0  ;;  %v629_v16 = vpop.f32.mrb[9].mxu1 }
 0x31c   :  { %v638_v18 = vmax.f32 %v629_v16, 0.0 }
 0x31e   :  { %v1077_v23 = vpack.c.bf16 %v639_v15, %v638_v18 }
 0x320   :  { %1079 = vmatpush3.bf16.msk.msra.mxu1 %vm1243_vm9, %v1077_v23 }
 0x321   :  { %1083 = vmatprep.subr.bf16.mxu1 %v1120_v7 }
 0x323   :  { %1043 = vmatmul.mubr.msk.f32.vlgmr.msra.gmra.mrb[10].mxu1 %vm245_vm10, %v653_v17 }
 0x324   :  { %1085 = vmatpush3.bf16.msra.mxu1 %v1084_v24  ;;  %1056 = vmatprep.mubr.msk.f32.mxu1 %vm1121_vm0, %v1122_v8 }
 0x327   :  { %1057 = vmatmul.mubr.msk.f32.vlgmr.msra.gmra.mrb[12].mxu1 %vm68_vm6, %v216_v48 }
 0x3f6   :  { %v726_v25 = vpop.f32.mrb[10].mxu1 }
 0x3f7   :  { %v1044_v26 = vpop.f32.mrb[11].mxu1  ;;  %1050 = vmatmul.mubr.msk.f32.vlgmr.msra.gmra.mrb[14].mxu0 %vm68_vm6, %v726_v25 }
 0x3fa   :  { %v876_v28 = vpop.f32.mrb[12].mxu1 }
 0x3fb   :  { %v1058_v29 = vpop.f32.mrb[13].mxu1 }
 0x4ca   :  { %v803_v27 = vpop.f32.mrb[14].mxu0 }
 0x4cb   :  { %v877_v7 = vadd.f32 %v876_v28, %v803_v27  ;;  %v1051_v31 = vpop.f32.mrb[15].mxu0 }
 0x4cd   :  { %v887_v32 = vadd.f32 %v940_v30, %v877_v7 }
 0x4cf   :  { %889 = vst.msk [vmem:[#allocation2] sm:$0x3] %vm888_vm8, %v887_v32 }
 0x4d0   :  { %1106 = shalt.err (!%p1103_p4)
}
 0x4d1   :  { %s1107_s27 = scalar_lea.hbm %s1369_s12, 32 }
 0x4d2   :  { %p1108_p5 = scmp.ne.s32.totalorder %s1369_s12, %s1107_s27  ;;  %p1111_p6 = scmp.lt.u32.totalorder %s1107_s27, %s1369_s12 }
 0x4d4   :  { %p1113_p7 = pnand %p1111_p6, %p1108_p5 }
 0x4d6   :  { %1116 = shalt.err (!%p1113_p7)
}
 0x4d7   :  { %899 = dma.vmem_to_hbm [thread:$0]  %s897_s24, 32, %s1369_s12, [#allocation3]  }
 0x4d8   :  { %1117 = dma.done.wait [#allocation3], 32  }
 0x4d9   :  { %1118 = vsyncadd [#allocation3], 4294967264 }
 0x4da   :  { %903 = vsyncpa [#allocation3], 1 }

</bundles_post_ra>
